<compile_context>
chip_gen: v5e
topology: v5e:2x2
jax: 0.10.0
libtpu: 0.0.40
codegen_flags: <defaults>
</compile_context>

<pallas_src>
import functools
import math

import jax
import jax.numpy as jnp
from jax import lax
from jax.experimental import pallas as pl
from jax.experimental.pallas import tpu as pltpu

_CH = 16                       # sublane chunk height of the inner loop
_LANES = 128
_GRAN = _CH * _LANES           # 2048-sample tile granule


def _ceil_to(x, m):
    return ((x + m - 1) // m) * m


def gmm_tile_kernel(wf_ref, bf_ref, cf_ref, xs_ref, out_ref,
                    *, K, D, S, tile_n, n_valid, num_tiles, needs_mask):
    """Accumulate sum_n logsumexp_k lp_k(x_n) over one tile of tile_n samples.

    wf_ref : (K*D*D,) f32 SMEM   W[k,d,e] = (L_k^{-1})^T[d,e] / sqrt(2)
    bf_ref : (K*D,)   f32 SMEM   b[k,e]   = -(L_k^{-1} @ loc_k)[e] / sqrt(2)
    cf_ref : (K,)     f32 SMEM   log_phi_k - sum(log diag L_k) - 0.5*D*log(2*pi)
    xs_ref : (D, S, 128) VMEM    sample n -> (:, n // 128, n % 128)
    out_ref: (1, 1, 128) VMEM    lane partial sums for this tile
    """
    i = pl.program_id(0)

    # Hoist every SMEM scalar read once per grid step; loop-invariant below.
    w = [[[wf_ref[(k * D + d) * D + e] for e in range(D)] for d in range(D)]
         for k in range(K)]
    b = [[bf_ref[k * D + e] for e in range(D)] for k in range(K)]
    c = [cf_ref[k] for k in range(K)]

    num_chunks = S // _CH

    def tile_sum(mask_tail):
        if mask_tail:
            # Within-chunk (sublane, lane) -> position offset, hoisted.
            pos = (lax.broadcasted_iota(jnp.int32, (_CH, _LANES), 0) * _LANES
                   + lax.broadcasted_iota(jnp.int32, (_CH, _LANES), 1))

        def chunk_body(j, acc):
            base = pl.multiple_of(j * _CH, _CH)
            x = [xs_ref[d, pl.ds(base, _CH), :] for d in range(D)]  # (CH,128)

            # Per-component log-density; K, D tiny & static -> unrolled VPU FMAs.
            lps = []
            for k in range(K):
                maha = None
                for e in range(D):
                    z = b[k][e]                       # mean folded into bias
                    for d in range(e + 1):            # Linv lower-tri -> d <= e
                        z = z + w[k][d][e] * x[d]
                    sq = z * z
                    maha = sq if maha is None else maha + sq
                lps.append(c[k] - maha)               # 0.5 pre-folded into W, b

            # Unrolled logsumexp over K components (no lane concatenation).
            m = lps[0]
            for k in range(1, K):
                m = jnp.maximum(m, lps[k])
            s = jnp.exp(lps[0] - m)
            for k in range(1, K):
                s = s + jnp.exp(lps[k] - m)
            lse = m + jnp.log(s)                      # (CH, 128)

            if mask_tail:
                # Valid iff global sample id < n_valid (padding only in last tile).
                limit = n_valid - i * tile_n - j * _GRAN
                lse = jnp.where(pos < limit, lse, 0.0)
            return acc + lse

        acc = lax.fori_loop(0, num_chunks, chunk_body,
                            jnp.zeros((_CH, _LANES), jnp.float32))
        out_ref[...] = jnp.sum(acc, axis=0).reshape(1, 1, _LANES)

    if not needs_mask:
        tile_sum(mask_tail=False)
    elif num_tiles == 1:
        tile_sum(mask_tail=True)
    else:
        # Only the last tile contains padded rows; interior tiles skip masking.
        @pl.when(i < num_tiles - 1)
        def _():
            tile_sum(mask_tail=False)

        @pl.when(i == num_tiles - 1)
        def _():
            tile_sum(mask_tail=True)


def gmm_mixture_logprob_sum(xs, W, b, const, *, tile_n=65536):
    """sum_n logsumexp_k [ log N(x_n; mu_k, Sigma_k) + log_phi_k ]."""
    N, D = xs.shape
    K = const.shape[0]

    # --- Tile selection ------------------------------------------------------
    # Granule = 2048 samples (16 sublanes x 128 lanes). Target ~tile_n samples
    # (~1 MiB input buffer) per tile, but keep >= 2 tiles whenever possible so
    # the v7x megacore gets work on both TensorCores via the parallel axis.
    num_gran = -(-N // _GRAN)
    tpg = max(1, min(tile_n // _GRAN, num_gran))
    if num_gran >= 2 and -(-num_gran // tpg) < 2:
        tpg = max(1, num_gran // 2)
    num_tiles = -(-num_gran // tpg)
    tile_n = tpg * _GRAN
    n_pad = num_tiles * tile_n            # padding always fits in the last tile
    S = tile_n // _LANES

    # TODO(synk): this pad+transpose is the one remaining XLA-side HBM pass
    # (review item #3); it disappears if callers cache xs in (D, N) layout or
    # if the transpose is fused into the pallas_call via allow_input_fusion.
    xs_p = jnp.pad(xs.astype(jnp.float32), ((0, n_pad - N), (0, 0)))
    xs_t = xs_p.T.reshape(D, n_pad // _LANES, _LANES)   # n -> (n // 128, n % 128)

    wf = W.astype(jnp.float32).reshape(-1)              # (K*D*D,)
    bf = b.astype(jnp.float32).reshape(-1)              # (K*D,)
    cf = const.astype(jnp.float32).reshape(-1)          # (K,)

    kernel = functools.partial(
        gmm_tile_kernel, K=K, D=D, S=S, tile_n=tile_n, n_valid=N,
        num_tiles=num_tiles, needs_mask=(n_pad != N))

    # Explicit VMEM budget: double-buffered input tile + small slack, safe on
    # v5e (16 MiB scoped default) and v7x (64 MiB physical).
    tile_bytes = D * tile_n * 4
    vmem_limit = int(min(max(4 * tile_bytes + (2 << 20), 16 << 20), 48 << 20))

    smem_spec = pl.BlockSpec(memory_space=pltpu.MemorySpace.SMEM)
    partials = pl.pallas_call(
        kernel,
        out_shape=jax.ShapeDtypeStruct((num_tiles, 1, _LANES), jnp.float32),
        grid_spec=pltpu.PrefetchScalarGridSpec(
            num_scalar_prefetch=0,
            grid=(num_tiles,),
            in_specs=[
                smem_spec,                                    # wf (SMEM scalars)
                smem_spec,                                    # bf
                smem_spec,                                    # cf
                pl.BlockSpec((D, S, _LANES), lambda i: (0, i, 0)),  # data tile
            ],
            out_specs=pl.BlockSpec((1, 1, _LANES), lambda i: (i, 0, 0)),
        ),
        compiler_params=pltpu.CompilerParams(
            dimension_semantics=("parallel",),
            vmem_limit_bytes=vmem_limit),
    )(wf, bf, cf, xs_t)

    return jnp.sum(partials)                                  # tiny final reduce


def forward(xs, loc, scale, corr, log_phi, *, tile_n=65536):
    """Full forward pass: plain-JAX parameter prep + Pallas hot path."""
    K, D = loc.shape
    tril = scale[..., None] * corr                            # diag_embed(scale) @ corr
    eye = jnp.eye(D, dtype=jnp.float32)
    Linv = jax.vmap(
        lambda L: jax.scipy.linalg.solve_triangular(L, eye, lower=True))(tril)
    Linv = jnp.tril(Linv)                                     # exact lower-triangular
    inv_sqrt2 = 1.0 / math.sqrt(2.0)                          # fold 0.5 of maha
    W = jnp.swapaxes(Linv, -1, -2) * inv_sqrt2                # W[k,d,e] = Linv[k,e,d]/sqrt2
    b = -jnp.einsum("ked,kd->ke", Linv, loc) * inv_sqrt2      # mean folded into bias
    half_log_det = jnp.sum(jnp.log(jnp.einsum("kii->ki", tril)), axis=-1)
    const = log_phi - half_log_det - 0.5 * D * math.log(2.0 * math.pi)

    lp = gmm_mixture_logprob_sum(xs, W, b, const, tile_n=tile_n)

    # TODO(synk): the Normal/HalfNormal/CholeskyLKJ/Simplex transform constraint
    # terms (log-det Jacobians) come from classes not provided with the module;
    # constraint is taken as 0 here.
    constraint = jnp.float32(0.0)
    return constraint + lp


def forward_reference(xs, loc, scale, corr, log_phi):
    """Pure-JAX reference of the same math for a correctness check."""
    K, D = loc.shape
    tril = scale[..., None] * corr
    eye = jnp.eye(D, dtype=jnp.float32)
    Linv = jax.vmap(
        lambda L: jax.scipy.linalg.solve_triangular(L, eye, lower=True))(tril)
    diff = xs[:, None, :] - loc[None, :, :]                   # (N, K, D)
    z = jnp.einsum("nkd,ked->nke", diff, Linv)
    maha = jnp.sum(z * z, axis=-1)                            # (N, K)
    half_log_det = jnp.sum(jnp.log(jnp.einsum("kii->ki", tril)), axis=-1)
    lp = (-0.5 * maha - half_log_det[None, :]
          - 0.5 * D * math.log(2.0 * math.pi) + log_phi[None, :])
    return jnp.sum(jax.scipy.special.logsumexp(lp, axis=1))


def build_params(key, K, D):
    """Deterministic synthetic parameters matching the module's shapes."""
    k1, k2, k3, k4 = jax.random.split(key, 4)
    # Normal(size=[K, D], loc=0, scale=2)
    loc = 2.0 * jax.random.normal(k1, (K, D), dtype=jnp.float32)
    # HalfNormal(size=[K, D], scale=1)
    scale = jnp.abs(jax.random.normal(k2, (K, D), dtype=jnp.float32)) + 0.1
    # CholeskyLKJ(size=[K, D]) -> lower-tri Cholesky of a correlation matrix
    A = jnp.tril(jax.random.normal(k3, (K, D, D), dtype=jnp.float32))
    diag = jnp.abs(jnp.einsum("kii->ki", A)) + 0.5
    A = A - jnp.einsum("kii->ki", A)[..., None] * jnp.eye(D) + diag[..., None] * jnp.eye(D)
    row_norm = jnp.sqrt(jnp.sum(A * A, axis=-1, keepdims=True))
    corr = A / row_norm                                       # rows unit-norm, positive diag
    # Simplex(size=K).log() -> log mixture weights
    log_phi = jax.nn.log_softmax(jax.random.normal(k4, (K,), dtype=jnp.float32))
    return loc, scale, corr, log_phi


if __name__ == "__main__":
    K, D = 3, 4                                               # n_components, ndim
    key = jax.random.PRNGKey(0)
    kx1, kx2, kx3, kp = jax.random.split(key, 4)
    loc, scale, corr, log_phi = build_params(kp, K, D)

    # Single-tile case with a padded tail (exercises the masked boundary path).
    xs_small = jax.random.normal(kx1, (200, D), dtype=jnp.float32)
    out_small = jax.block_until_ready(forward(xs_small, loc, scale, corr, log_phi))
    ref_small = forward_reference(xs_small, loc, scale, corr, log_phi)
    assert jnp.allclose(out_small, ref_small, rtol=1e-4, atol=1e-3), (out_small, ref_small)

    # Multi-tile, exact multiple of the granule (static unmasked path, 2 tiles).
    xs_even = jax.random.normal(kx2, (4096, D), dtype=jnp.float32)
    out_even = jax.block_until_ready(forward(xs_even, loc, scale, corr, log_phi))
    ref_even = forward_reference(xs_even, loc, scale, corr, log_phi)
    assert jnp.allclose(out_even, ref_even, rtol=1e-4, atol=1e-3), (out_even, ref_even)

    # Multi-tile with a masked boundary tile (interior tiles skip masking).
    xs_big = jax.random.normal(kx3, (6000, D), dtype=jnp.float32)
    out_big = jax.block_until_ready(forward(xs_big, loc, scale, corr, log_phi))
    ref_big = forward_reference(xs_big, loc, scale, corr, log_phi)
    assert jnp.allclose(out_big, ref_big, rtol=1e-4, atol=1e-3), (out_big, ref_big)

    print("KERNEL_OK")
</pallas_src>

<mosaic_0001>
module attributes {stable_mosaic.version = 11 : i64} {
  func.func @gmm_tile_kernel(%arg0: i32, %arg1: memref<48xf32, #tpu.memory_space<smem>>, %arg2: memref<12xf32, #tpu.memory_space<smem>>, %arg3: memref<3xf32, #tpu.memory_space<smem>>, %arg4: memref<4x16x128xf32, #tpu.memory_space<vmem>>, %arg5: memref<1x1x128xf32, #tpu.memory_space<vmem>>) attributes {dimension_semantics = [#tpu.dimension_semantics<parallel>], iteration_bounds = array<i64: 1>, scalar_prefetch = 0 : i64, scratch_operands = 0 : i64, tpu.core_type = #tpu.core_type<tc>, window_params = [{transform_indices = @transform_0, window_bounds = array<i64: 48>}, {transform_indices = @transform_1, window_bounds = array<i64: 12>}, {transform_indices = @transform_2, window_bounds = array<i64: 3>}, {transform_indices = @transform_3, window_bounds = array<i64: 4, 16, 128>}, {transform_indices = @transform_4, window_bounds = array<i64: 1, 1, 128>}]} {
    %c0 = arith.constant 0 : index
    %0 = memref.load %arg1[%c0] : memref<48xf32, #tpu.memory_space<smem>>
    %c1 = arith.constant 1 : index
    %1 = memref.load %arg1[%c1] : memref<48xf32, #tpu.memory_space<smem>>
    %c2 = arith.constant 2 : index
    %2 = memref.load %arg1[%c2] : memref<48xf32, #tpu.memory_space<smem>>
    %c3 = arith.constant 3 : index
    %3 = memref.load %arg1[%c3] : memref<48xf32, #tpu.memory_space<smem>>
    %c5 = arith.constant 5 : index
    %4 = memref.load %arg1[%c5] : memref<48xf32, #tpu.memory_space<smem>>
    %c6 = arith.constant 6 : index
    %5 = memref.load %arg1[%c6] : memref<48xf32, #tpu.memory_space<smem>>
    %c7 = arith.constant 7 : index
    %6 = memref.load %arg1[%c7] : memref<48xf32, #tpu.memory_space<smem>>
    %c10 = arith.constant 10 : index
    %7 = memref.load %arg1[%c10] : memref<48xf32, #tpu.memory_space<smem>>
    %c11 = arith.constant 11 : index
    %8 = memref.load %arg1[%c11] : memref<48xf32, #tpu.memory_space<smem>>
    %c15 = arith.constant 15 : index
    %9 = memref.load %arg1[%c15] : memref<48xf32, #tpu.memory_space<smem>>
    %c16 = arith.constant 16 : index
    %10 = memref.load %arg1[%c16] : memref<48xf32, #tpu.memory_space<smem>>
    %c17 = arith.constant 17 : index
    %11 = memref.load %arg1[%c17] : memref<48xf32, #tpu.memory_space<smem>>
    %c18 = arith.constant 18 : index
    %12 = memref.load %arg1[%c18] : memref<48xf32, #tpu.memory_space<smem>>
    %c19 = arith.constant 19 : index
    %13 = memref.load %arg1[%c19] : memref<48xf32, #tpu.memory_space<smem>>
    %c21 = arith.constant 21 : index
    %14 = memref.load %arg1[%c21] : memref<48xf32, #tpu.memory_space<smem>>
    %c22 = arith.constant 22 : index
    %15 = memref.load %arg1[%c22] : memref<48xf32, #tpu.memory_space<smem>>
    %c23 = arith.constant 23 : index
    %16 = memref.load %arg1[%c23] : memref<48xf32, #tpu.memory_space<smem>>
    %c26 = arith.constant 26 : index
    %17 = memref.load %arg1[%c26] : memref<48xf32, #tpu.memory_space<smem>>
    %c27 = arith.constant 27 : index
    %18 = memref.load %arg1[%c27] : memref<48xf32, #tpu.memory_space<smem>>
    %c31 = arith.constant 31 : index
    %19 = memref.load %arg1[%c31] : memref<48xf32, #tpu.memory_space<smem>>
    %c32 = arith.constant 32 : index
    %20 = memref.load %arg1[%c32] : memref<48xf32, #tpu.memory_space<smem>>
    %c33 = arith.constant 33 : index
    %21 = memref.load %arg1[%c33] : memref<48xf32, #tpu.memory_space<smem>>
    %c34 = arith.constant 34 : index
    %22 = memref.load %arg1[%c34] : memref<48xf32, #tpu.memory_space<smem>>
    %c35 = arith.constant 35 : index
    %23 = memref.load %arg1[%c35] : memref<48xf32, #tpu.memory_space<smem>>
    %c37 = arith.constant 37 : index
    %24 = memref.load %arg1[%c37] : memref<48xf32, #tpu.memory_space<smem>>
    %c38 = arith.constant 38 : index
    %25 = memref.load %arg1[%c38] : memref<48xf32, #tpu.memory_space<smem>>
    %c39 = arith.constant 39 : index
    %26 = memref.load %arg1[%c39] : memref<48xf32, #tpu.memory_space<smem>>
    %c42 = arith.constant 42 : index
    %27 = memref.load %arg1[%c42] : memref<48xf32, #tpu.memory_space<smem>>
    %c43 = arith.constant 43 : index
    %28 = memref.load %arg1[%c43] : memref<48xf32, #tpu.memory_space<smem>>
    %c47 = arith.constant 47 : index
    %29 = memref.load %arg1[%c47] : memref<48xf32, #tpu.memory_space<smem>>
    %c0_0 = arith.constant 0 : index
    %30 = memref.load %arg2[%c0_0] : memref<12xf32, #tpu.memory_space<smem>>
    %c1_1 = arith.constant 1 : index
    %31 = memref.load %arg2[%c1_1] : memref<12xf32, #tpu.memory_space<smem>>
    %c2_2 = arith.constant 2 : index
    %32 = memref.load %arg2[%c2_2] : memref<12xf32, #tpu.memory_space<smem>>
    %c3_3 = arith.constant 3 : index
    %33 = memref.load %arg2[%c3_3] : memref<12xf32, #tpu.memory_space<smem>>
    %c4 = arith.constant 4 : index
    %34 = memref.load %arg2[%c4] : memref<12xf32, #tpu.memory_space<smem>>
    %c5_4 = arith.constant 5 : index
    %35 = memref.load %arg2[%c5_4] : memref<12xf32, #tpu.memory_space<smem>>
    %c6_5 = arith.constant 6 : index
    %36 = memref.load %arg2[%c6_5] : memref<12xf32, #tpu.memory_space<smem>>
    %c7_6 = arith.constant 7 : index
    %37 = memref.load %arg2[%c7_6] : memref<12xf32, #tpu.memory_space<smem>>
    %c8 = arith.constant 8 : index
    %38 = memref.load %arg2[%c8] : memref<12xf32, #tpu.memory_space<smem>>
    %c9 = arith.constant 9 : index
    %39 = memref.load %arg2[%c9] : memref<12xf32, #tpu.memory_space<smem>>
    %c10_7 = arith.constant 10 : index
    %40 = memref.load %arg2[%c10_7] : memref<12xf32, #tpu.memory_space<smem>>
    %c11_8 = arith.constant 11 : index
    %41 = memref.load %arg2[%c11_8] : memref<12xf32, #tpu.memory_space<smem>>
    %c0_9 = arith.constant 0 : index
    %42 = memref.load %arg3[%c0_9] : memref<3xf32, #tpu.memory_space<smem>>
    %c1_10 = arith.constant 1 : index
    %43 = memref.load %arg3[%c1_10] : memref<3xf32, #tpu.memory_space<smem>>
    %c2_11 = arith.constant 2 : index
    %44 = memref.load %arg3[%c2_11] : memref<3xf32, #tpu.memory_space<smem>>
    %45 = tpu.iota {dimensions = array<i32: 0>} : vector<16x128xi32>
    %c128_i32 = arith.constant 128 : i32
    %46 = vector.broadcast %c128_i32 : i32 to vector<16x128xi32>
    %47 = arith.muli %45, %46 : vector<16x128xi32>
    %48 = tpu.iota {dimensions = array<i32: 1>} : vector<16x128xi32>
    %49 = arith.addi %47, %48 : vector<16x128xi32>
    %cst = arith.constant 0.000000e+00 : f32
    %50 = vector.broadcast %cst : f32 to vector<16x128xf32>
    %c0_i32 = arith.constant 0 : i32
    %c16_i32 = arith.constant 16 : i32
    %51 = arith.muli %c0_i32, %c16_i32 : i32
    %52 = tpu.assume_multiple %51, 16 : i32
    %c0_12 = arith.constant 0 : index
    %53 = arith.index_cast %52 : i32 to index
    %c0_13 = arith.constant 0 : index
    %54 = vector.load %arg4[%c0_12, %53, %c0_13] : memref<4x16x128xf32, #tpu.memory_space<vmem>>, vector<1x16x128xf32>
    %55 = vector.shape_cast %54 : vector<1x16x128xf32> to vector<16x128xf32>
    %c1_14 = arith.constant 1 : index
    %56 = arith.index_cast %52 : i32 to index
    %c0_15 = arith.constant 0 : index
    %57 = vector.load %arg4[%c1_14, %56, %c0_15] : memref<4x16x128xf32, #tpu.memory_space<vmem>>, vector<1x16x128xf32>
    %58 = vector.shape_cast %57 : vector<1x16x128xf32> to vector<16x128xf32>
    %c2_16 = arith.constant 2 : index
    %59 = arith.index_cast %52 : i32 to index
    %c0_17 = arith.constant 0 : index
    %60 = vector.load %arg4[%c2_16, %59, %c0_17] : memref<4x16x128xf32, #tpu.memory_space<vmem>>, vector<1x16x128xf32>
    %61 = vector.shape_cast %60 : vector<1x16x128xf32> to vector<16x128xf32>
    %c3_18 = arith.constant 3 : index
    %62 = arith.index_cast %52 : i32 to index
    %c0_19 = arith.constant 0 : index
    %63 = vector.load %arg4[%c3_18, %62, %c0_19] : memref<4x16x128xf32, #tpu.memory_space<vmem>>, vector<1x16x128xf32>
    %64 = vector.shape_cast %63 : vector<1x16x128xf32> to vector<16x128xf32>
    %65 = vector.broadcast %0 : f32 to vector<16x128xf32>
    %66 = arith.mulf %65, %55 : vector<16x128xf32>
    %67 = vector.broadcast %30 : f32 to vector<16x128xf32>
    %68 = arith.addf %67, %66 : vector<16x128xf32>
    %69 = arith.mulf %68, %68 : vector<16x128xf32>
    %70 = vector.broadcast %1 : f32 to vector<16x128xf32>
    %71 = arith.mulf %70, %55 : vector<16x128xf32>
    %72 = vector.broadcast %31 : f32 to vector<16x128xf32>
    %73 = arith.addf %72, %71 : vector<16x128xf32>
    %74 = vector.broadcast %4 : f32 to vector<16x128xf32>
    %75 = arith.mulf %74, %58 : vector<16x128xf32>
    %76 = arith.addf %73, %75 : vector<16x128xf32>
    %77 = arith.mulf %76, %76 : vector<16x128xf32>
    %78 = arith.addf %69, %77 : vector<16x128xf32>
    %79 = vector.broadcast %2 : f32 to vector<16x128xf32>
    %80 = arith.mulf %79, %55 : vector<16x128xf32>
    %81 = vector.broadcast %32 : f32 to vector<16x128xf32>
    %82 = arith.addf %81, %80 : vector<16x128xf32>
    %83 = vector.broadcast %5 : f32 to vector<16x128xf32>
    %84 = arith.mulf %83, %58 : vector<16x128xf32>
    %85 = arith.addf %82, %84 : vector<16x128xf32>
    %86 = vector.broadcast %7 : f32 to vector<16x128xf32>
    %87 = arith.mulf %86, %61 : vector<16x128xf32>
    %88 = arith.addf %85, %87 : vector<16x128xf32>
    %89 = arith.mulf %88, %88 : vector<16x128xf32>
    %90 = arith.addf %78, %89 : vector<16x128xf32>
    %91 = vector.broadcast %3 : f32 to vector<16x128xf32>
    %92 = arith.mulf %91, %55 : vector<16x128xf32>
    %93 = vector.broadcast %33 : f32 to vector<16x128xf32>
    %94 = arith.addf %93, %92 : vector<16x128xf32>
    %95 = vector.broadcast %6 : f32 to vector<16x128xf32>
    %96 = arith.mulf %95, %58 : vector<16x128xf32>
    %97 = arith.addf %94, %96 : vector<16x128xf32>
    %98 = vector.broadcast %8 : f32 to vector<16x128xf32>
    %99 = arith.mulf %98, %61 : vector<16x128xf32>
    %100 = arith.addf %97, %99 : vector<16x128xf32>
    %101 = vector.broadcast %9 : f32 to vector<16x128xf32>
    %102 = arith.mulf %101, %64 : vector<16x128xf32>
    %103 = arith.addf %100, %102 : vector<16x128xf32>
    %104 = arith.mulf %103, %103 : vector<16x128xf32>
    %105 = arith.addf %90, %104 : vector<16x128xf32>
    %106 = vector.broadcast %42 : f32 to vector<16x128xf32>
    %107 = arith.subf %106, %105 : vector<16x128xf32>
    %108 = vector.broadcast %10 : f32 to vector<16x128xf32>
    %109 = arith.mulf %108, %55 : vector<16x128xf32>
    %110 = vector.broadcast %34 : f32 to vector<16x128xf32>
    %111 = arith.addf %110, %109 : vector<16x128xf32>
    %112 = arith.mulf %111, %111 : vector<16x128xf32>
    %113 = vector.broadcast %11 : f32 to vector<16x128xf32>
    %114 = arith.mulf %113, %55 : vector<16x128xf32>
    %115 = vector.broadcast %35 : f32 to vector<16x128xf32>
    %116 = arith.addf %115, %114 : vector<16x128xf32>
    %117 = vector.broadcast %14 : f32 to vector<16x128xf32>
    %118 = arith.mulf %117, %58 : vector<16x128xf32>
    %119 = arith.addf %116, %118 : vector<16x128xf32>
    %120 = arith.mulf %119, %119 : vector<16x128xf32>
    %121 = arith.addf %112, %120 : vector<16x128xf32>
    %122 = vector.broadcast %12 : f32 to vector<16x128xf32>
    %123 = arith.mulf %122, %55 : vector<16x128xf32>
    %124 = vector.broadcast %36 : f32 to vector<16x128xf32>
    %125 = arith.addf %124, %123 : vector<16x128xf32>
    %126 = vector.broadcast %15 : f32 to vector<16x128xf32>
    %127 = arith.mulf %126, %58 : vector<16x128xf32>
    %128 = arith.addf %125, %127 : vector<16x128xf32>
    %129 = vector.broadcast %17 : f32 to vector<16x128xf32>
    %130 = arith.mulf %129, %61 : vector<16x128xf32>
    %131 = arith.addf %128, %130 : vector<16x128xf32>
    %132 = arith.mulf %131, %131 : vector<16x128xf32>
    %133 = arith.addf %121, %132 : vector<16x128xf32>
    %134 = vector.broadcast %13 : f32 to vector<16x128xf32>
    %135 = arith.mulf %134, %55 : vector<16x128xf32>
    %136 = vector.broadcast %37 : f32 to vector<16x128xf32>
    %137 = arith.addf %136, %135 : vector<16x128xf32>
    %138 = vector.broadcast %16 : f32 to vector<16x128xf32>
    %139 = arith.mulf %138, %58 : vector<16x128xf32>
    %140 = arith.addf %137, %139 : vector<16x128xf32>
    %141 = vector.broadcast %18 : f32 to vector<16x128xf32>
    %142 = arith.mulf %141, %61 : vector<16x128xf32>
    %143 = arith.addf %140, %142 : vector<16x128xf32>
    %144 = vector.broadcast %19 : f32 to vector<16x128xf32>
    %145 = arith.mulf %144, %64 : vector<16x128xf32>
    %146 = arith.addf %143, %145 : vector<16x128xf32>
    %147 = arith.mulf %146, %146 : vector<16x128xf32>
    %148 = arith.addf %133, %147 : vector<16x128xf32>
    %149 = vector.broadcast %43 : f32 to vector<16x128xf32>
    %150 = arith.subf %149, %148 : vector<16x128xf32>
    %151 = vector.broadcast %20 : f32 to vector<16x128xf32>
    %152 = arith.mulf %151, %55 : vector<16x128xf32>
    %153 = vector.broadcast %38 : f32 to vector<16x128xf32>
    %154 = arith.addf %153, %152 : vector<16x128xf32>
    %155 = arith.mulf %154, %154 : vector<16x128xf32>
    %156 = vector.broadcast %21 : f32 to vector<16x128xf32>
    %157 = arith.mulf %156, %55 : vector<16x128xf32>
    %158 = vector.broadcast %39 : f32 to vector<16x128xf32>
    %159 = arith.addf %158, %157 : vector<16x128xf32>
    %160 = vector.broadcast %24 : f32 to vector<16x128xf32>
    %161 = arith.mulf %160, %58 : vector<16x128xf32>
    %162 = arith.addf %159, %161 : vector<16x128xf32>
    %163 = arith.mulf %162, %162 : vector<16x128xf32>
    %164 = arith.addf %155, %163 : vector<16x128xf32>
    %165 = vector.broadcast %22 : f32 to vector<16x128xf32>
    %166 = arith.mulf %165, %55 : vector<16x128xf32>
    %167 = vector.broadcast %40 : f32 to vector<16x128xf32>
    %168 = arith.addf %167, %166 : vector<16x128xf32>
    %169 = vector.broadcast %25 : f32 to vector<16x128xf32>
    %170 = arith.mulf %169, %58 : vector<16x128xf32>
    %171 = arith.addf %168, %170 : vector<16x128xf32>
    %172 = vector.broadcast %27 : f32 to vector<16x128xf32>
    %173 = arith.mulf %172, %61 : vector<16x128xf32>
    %174 = arith.addf %171, %173 : vector<16x128xf32>
    %175 = arith.mulf %174, %174 : vector<16x128xf32>
    %176 = arith.addf %164, %175 : vector<16x128xf32>
    %177 = vector.broadcast %23 : f32 to vector<16x128xf32>
    %178 = arith.mulf %177, %55 : vector<16x128xf32>
    %179 = vector.broadcast %41 : f32 to vector<16x128xf32>
    %180 = arith.addf %179, %178 : vector<16x128xf32>
    %181 = vector.broadcast %26 : f32 to vector<16x128xf32>
    %182 = arith.mulf %181, %58 : vector<16x128xf32>
    %183 = arith.addf %180, %182 : vector<16x128xf32>
    %184 = vector.broadcast %28 : f32 to vector<16x128xf32>
    %185 = arith.mulf %184, %61 : vector<16x128xf32>
    %186 = arith.addf %183, %185 : vector<16x128xf32>
    %187 = vector.broadcast %29 : f32 to vector<16x128xf32>
    %188 = arith.mulf %187, %64 : vector<16x128xf32>
    %189 = arith.addf %186, %188 : vector<16x128xf32>
    %190 = arith.mulf %189, %189 : vector<16x128xf32>
    %191 = arith.addf %176, %190 : vector<16x128xf32>
    %192 = vector.broadcast %44 : f32 to vector<16x128xf32>
    %193 = arith.subf %192, %191 : vector<16x128xf32>
    %194 = arith.maximumf %107, %150 : vector<16x128xf32>
    %195 = arith.maximumf %194, %193 : vector<16x128xf32>
    %196 = arith.subf %107, %195 : vector<16x128xf32>
    %197 = math.exp %196 : vector<16x128xf32>
    %198 = arith.subf %150, %195 : vector<16x128xf32>
    %199 = math.exp %198 : vector<16x128xf32>
    %200 = arith.addf %197, %199 : vector<16x128xf32>
    %201 = arith.subf %193, %195 : vector<16x128xf32>
    %202 = math.exp %201 : vector<16x128xf32>
    %203 = arith.addf %200, %202 : vector<16x128xf32>
    %204 = math.log %203 : vector<16x128xf32>
    %205 = arith.addf %195, %204 : vector<16x128xf32>
    %c2048_i32 = arith.constant 2048 : i32
    %206 = arith.muli %arg0, %c2048_i32 : i32
    %c200_i32 = arith.constant 200 : i32
    %207 = arith.subi %c200_i32, %206 : i32
    %c2048_i32_20 = arith.constant 2048 : i32
    %208 = arith.muli %c0_i32, %c2048_i32_20 : i32
    %209 = arith.subi %207, %208 : i32
    %210 = vector.broadcast %209 : i32 to vector<16x128xi32>
    %211 = arith.cmpi slt, %49, %210 : vector<16x128xi32>
    %cst_21 = arith.constant 0.000000e+00 : f32
    %212 = vector.broadcast %cst_21 : f32 to vector<16x128xf32>
    %213 = arith.select %211, %205, %212 : vector<16x128xi1>, vector<16x128xf32>
    %214 = arith.addf %50, %213 : vector<16x128xf32>
    %c1_i32 = arith.constant 1 : i32
    %cst_22 = arith.constant dense<0.000000e+00> : vector<128xf32>
    %215 = vector.multi_reduction <add>, %214, %cst_22 [0] : vector<16x128xf32> to vector<128xf32>
    %216 = vector.shape_cast %215 : vector<128xf32> to vector<1x1x128xf32>
    %c0_23 = arith.constant 0 : index
    %c0_24 = arith.constant 0 : index
    %c0_25 = arith.constant 0 : index
    %217 = vector.load %arg5[%c0_23, %c0_24, %c0_25] : memref<1x1x128xf32, #tpu.memory_space<vmem>>, vector<1x1x128xf32>
    tpu.vector_store %arg5[%c0_23, %c0_24, %c0_25], %216 {strides = array<i32>} : memref<1x1x128xf32, #tpu.memory_space<vmem>>, vector<1x1x128xf32>,
    return
  }
  func.func @transform_0(%arg0: i32) -> i32 {
    %c0_i32 = arith.constant 0 : i32
    %c0_i32_0 = arith.constant 0 : i32
    return %c0_i32 : i32
  }
  func.func @transform_1(%arg0: i32) -> i32 {
    %c0_i32 = arith.constant 0 : i32
    %c0_i32_0 = arith.constant 0 : i32
    return %c0_i32 : i32
  }
  func.func @transform_2(%arg0: i32) -> i32 {
    %c0_i32 = arith.constant 0 : i32
    %c0_i32_0 = arith.constant 0 : i32
    return %c0_i32 : i32
  }
  func.func @transform_3(%arg0: i32) -> (i32, i32, i32) {
    %c0_i32 = arith.constant 0 : i32
    %c0_i32_0 = arith.constant 0 : i32
    %c0_i32_1 = arith.constant 0 : i32
    return %c0_i32, %arg0, %c0_i32_0 : i32, i32, i32
  }
  func.func @transform_4(%arg0: i32) -> (i32, i32, i32) {
    %c0_i32 = arith.constant 0 : i32
    %c0_i32_0 = arith.constant 0 : i32
    %c0_i32_1 = arith.constant 0 : i32
    return %arg0, %c0_i32, %c0_i32_0 : i32, i32, i32
  }
}

</mosaic_0001>

<bundles_post_ra>
// kernel: tpu_custom_call.1
= control target key start
LH: loop header
LB: loop body
LE: loop exit
PB: predicated region body
PF: predicated region fallthrough
CT: control target
= control target key end

     0   :  { %9 = vsyncpa [#allocation5], 0  ;;  %s1015_s0 = inlined_call_operand.hbm [shape: f32[48], index: 0, kind: input, shape index: {}]   ;;  %s1016_s1 = inlined_call_operand.hbm [shape: f32[12], index: 1, kind: input, shape index: {}]   ;;  %s1017_s2 = inlined_call_operand.vmem [shape: f32[3], index: 2, kind: input, shape index: {}]   ;;  %s1018_s3 = inlined_call_operand.hbm [shape: f32[4,16,128], index: 3, kind: input, shape index: {}]   ;;  %s1019_s4 = inlined_call_operand.hbm [shape: f32[1,1,128], index: 4, kind: output, shape index: {}]  }
   0x1   :  { %10 = vsyncpa [#allocation8], 0 }
   0x2   :  { %11 = vsyncpa [#allocation6], 0 }
   0x3   :  { %12 = vsyncpa [#allocation3], 0 }
   0x4   :  { %13 = vsyncpa [#allocation4], 0  ;;  %s19_s17 = sshll.u32 %s1015_s0, 4  ;;  %s28_s20 = sshll.u32 %s1016_s1, 4  ;;  %s20_s17 = int_to_ptr.hbm [resolvable:$true] %s19_s17  ;;  %s29_s20 = int_to_ptr.hbm [resolvable:$true] %s28_s20 }
   0x5   :  { %s583_s21 = smov [#allocation2]   ;;  %s584_s22 = smov [#allocation7]  }
   0x6   :  { %22 = dma.hbm_to_smem %s20_s17, 16, %s583_s21, [#allocation5]  }
   0x7   :  { %31 = dma.hbm_to_smem %s29_s20, 16, %s584_s22, [#allocation8]  }
   0x8   :  { %s37_s25 = sshll.u32 %s1017_s2, 4  ;;  %s45_s28 = sshll.u32 %s1018_s3, 4  ;;  %s38_s25 = int_to_ptr.vmem [resolvable:$true] %s37_s25  ;;  %s46_s28 = int_to_ptr.hbm [resolvable:$true] %s45_s28 }
   0x9   :  { %s585_s0 = smov [#allocation9]   ;;  %s586_s29 = smov [#allocation10]  }
   0xa   :  { %40 = dma.vmem_to_smem %s38_s25, 16, %s585_s0, [#allocation6]  }
   0xb   :  { %s47_s30 = sshll.u32 %s586_s29, 4  ;;  %s587_s1 = smov 128   ;;  %s48_s30 = int_to_ptr.vmem [resolvable:$true] %s47_s30 }
   0xc   :  { %s588_s5 = smov 8  }
   0xd   :  { %53 = dma.hbm_to_vmem [thread:$0]  %s46_s28, 1024, %s48_s30, [#allocation3], %s587_s1, %s587_s1, %s588_s5  }
   0xe   :  { %573 = dma.done.wait [#allocation5], 16  }
   0xf   :  { %574 = vsyncadd [#allocation5], 4294967280 }
  0x10   :  { %575 = dma.done.wait [#allocation8], 16  }
  0x11   :  { %576 = vsyncadd [#allocation8], 4294967280 }
  0x12   :  { %577 = dma.done.wait [#allocation6], 16  }
  0x13   :  { %578 = vsyncadd [#allocation6], 4294967280 }
  0x14   :  { %579 = dma.done.wait [#allocation3], 1024  }
  0x15   :  { %580 = vsyncadd [#allocation3], 4294966272 }
  0x16   :  { %70 = sfence }
  0x17   :  { %s627_s2 = sld [smem:[#allocation2]]  ;;  %v655_v0 = vld [vmem:[#allocation10] sm:$0xff]  ;;  %v659_v2 = vld [vmem:[#allocation10 + $0x8] sm:$0xff]  ;;  %v664_v4 = vld [vmem:[#allocation10 + $0x10] sm:$0xff] }
  0x18   :  { %s424_s3 = sld [smem:[#allocation2 + $0x1]]  ;;  %v670_v7 = vld [vmem:[#allocation10 + $0x18] sm:$0xff]  ;;  %v678_v10 = vld [vmem:[#allocation10 + $0x20] sm:$0xff]  ;;  %v690_v15 = vld [vmem:[#allocation10 + $0x28] sm:$0xff] }
  0x19   :  { %s629_s6 = sld [smem:[#allocation2 + $0x2]]  ;;  %v716_v24 = vld [vmem:[#allocation10 + $0x30] sm:$0xff]  ;;  %v718_v25 = vld [vmem:[#allocation10 + $0x38] sm:$0xff] }
  0x1a   :  { %s631_s7 = sld [smem:[#allocation2 + $0x3]] }
  0x1b   :  { %s633_s8 = sld [smem:[#allocation2 + $0x5]] }
  0x1c   :  { %s635_s9 = sld [smem:[#allocation2 + $0x6]] }
  0x1d   :  { %s637_s10 = sld [smem:[#allocation2 + $0x7]]  ;;  %v139_v3 = vstv %s627_s2 }
  0x1e   :  { %s639_s11 = sld [smem:[#allocation2 + $0xa]]  ;;  %v147_v1 = vstv %s424_s3  ;;  %v681_v11 = vmul.f32 %v139_v3, %v655_v0  ;;  %v693_v16 = vmul.f32 %v139_v3, %v659_v2 }
  0x1f   :  { %s641_s12 = sld [smem:[#allocation2 + $0xb]]  ;;  %v162_v6 = vstv %s629_s6  ;;  %v673_v8 = vmul.f32 %v147_v1, %v655_v0  ;;  %v684_v12 = vmul.f32 %v147_v1, %v659_v2 }
  0x20   :  { %s643_s13 = sld [smem:[#allocation2 + $0xf]]  ;;  %v182_v9 = vstv %s631_s7  ;;  %v699_v18 = vmul.f32 %v162_v6, %v655_v0  ;;  %v708_v21 = vmul.f32 %v162_v6, %v659_v2 }
  0x21   :  { %s645_s14 = sld [smem:[#allocation2 + $0x10]]  ;;  %v153_v5 = vstv %s633_s8  ;;  %v711_v22 = vmul.f32 %v182_v9, %v655_v0  ;;  %v736_v31 = vmul.f32 %v182_v9, %v659_v2 }
  0x22   :  { %s647_s15 = sld [smem:[#allocation2 + $0x11]]  ;;  %v168_v13 = vstv %s635_s9  ;;  %v696_v17 = vmul.f32 %v153_v5, %v664_v4  ;;  %v705_v20 = vmul.f32 %v153_v5, %v670_v7 }
  0x23   :  { %s649_s16 = sld [smem:[#allocation2 + $0x12]]  ;;  %v188_v19 = vstv %s637_s10  ;;  %v721_v26 = vmul.f32 %v168_v13, %v664_v4  ;;  %v724_v27 = vmul.f32 %v168_v13, %v670_v7 }
  0x24   :  { %s651_s17 = sld [smem:[#allocation2 + $0x13]]  ;;  %v173_v14 = vstv %s639_s11  ;;  %v739_v32 = vmul.f32 %v188_v19, %v664_v4  ;;  %v745_v34 = vmul.f32 %v188_v19, %v670_v7 }
  0x25   :  { %s653_s18 = sld [smem:[#allocation2 + $0x15]]  ;;  %v193_v23 = vstv %s641_s12  ;;  %v727_v28 = vmul.f32 %v173_v14, %v678_v10  ;;  %v733_v30 = vmul.f32 %v173_v14, %v690_v15 }
  0x26   :  { %s657_s19 = sld [smem:[#allocation2 + $0x16]]  ;;  %v198_v29 = vstv %s643_s13  ;;  %v748_v35 = vmul.f32 %v193_v23, %v678_v10  ;;  %v755_v38 = vmul.f32 %v193_v23, %v690_v15 }
  0x27   :  { %s662_s20 = sld [smem:[#allocation2 + $0x17]]  ;;  %v210_v33 = vstv %s645_s14  ;;  %v758_v39 = vmul.f32 %v198_v29, %v716_v24  ;;  %v761_v40 = vmul.f32 %v198_v29, %v718_v25 }
  0x28   :  { %s668_s21 = sld [smem:[#allocation2 + $0x1a]]  ;;  %v218_v36 = vstv %s647_s15  ;;  %v767_v42 = vmul.f32 %v210_v33, %v655_v0  ;;  %v770_v43 = vmul.f32 %v210_v33, %v659_v2 }
  0x29   :  { %s676_s22 = sld [smem:[#allocation2 + $0x1b]]  ;;  %v233_v41 = vstv %s649_s16  ;;  %v777_v46 = vmul.f32 %v218_v36, %v655_v0  ;;  %v780_v47 = vmul.f32 %v218_v36, %v659_v2 }
  0x2a   :  { %s688_s23 = sld [smem:[#allocation2 + $0x1f]]  ;;  %v253_v49 = vstv %s651_s17  ;;  %v792_v51 = vmul.f32 %v233_v41, %v655_v0  ;;  %v795_v52 = vmul.f32 %v233_v41, %v659_v2 }
  0x2b   :  { %s702_s24 = sld [smem:[#allocation2 + $0x20]]  ;;  %v224_v37 = vstv %s653_s18  ;;  %v816_v59 = vmul.f32 %v253_v49, %v655_v0  ;;  %v823_v62 = vmul.f32 %v253_v49, %v659_v2 }
  0x2c   :  { %s714_s25 = sld [smem:[#allocation2 + $0x21]]  ;;  %v239_v44 = vstv %s657_s19  ;;  %v783_v48 = vmul.f32 %v224_v37, %v664_v4  ;;  %v789_v50 = vmul.f32 %v224_v37, %v670_v7  ;;  %s589_s19 = smov [#allocation11]  }
  0x2d   :  { %s730_s26 = sld [smem:[#allocation2 + $0x22]]  ;;  %v259_v53 = vstv %s662_s20  ;;  %v801_v54 = vmul.f32 %v239_v44, %v664_v4  ;;  %v804_v55 = vmul.f32 %v239_v44, %v670_v7  ;;  %s406_s20 = sshll.u32 %s589_s19, 4  ;;  %s407_s20 = int_to_ptr.vmem [resolvable:$true] %s406_s20 }
  0x2e   :  { %s742_s27 = sld [smem:[#allocation2 + $0x23]]  ;;  %v244_v45 = vstv %s668_s21  ;;  %v826_v63 = vmul.f32 %v259_v53, %v664_v4  ;;  %v829_v1 = vmul.f32 %v259_v53, %v670_v7 }
  0x2f   :  { %s752_s28 = sld [smem:[#allocation2 + $0x25]]  ;;  %v807_v56 = vmul.f32 %v244_v45, %v678_v10  ;;  %v264_v57 = vstv %s676_s22  ;;  %v813_v58 = vmul.f32 %v244_v45, %v690_v15 }
  0x30   :  { %s764_s0 = sld [smem:[#allocation2 + $0x26]]  ;;  %v269_v60 = vstv %s688_s23  ;;  %v835_v5 = vmul.f32 %v264_v57, %v678_v10  ;;  %v838_v6 = vmul.f32 %v264_v57, %v690_v15  ;;  %s408_s23 = sshll.u32 %s1019_s4, 4  ;;  %s409_s23 = int_to_ptr.hbm [resolvable:$true] %s408_s23 }
  0x31   :  { %s774_s29 = sld [smem:[#allocation2 + $0x27]]  ;;  %v281_v61 = vstv %s702_s24  ;;  %v845_v14 = vmul.f32 %v269_v60, %v716_v24  ;;  %v848_v19 = vmul.f32 %v269_v60, %v718_v25 }
  0x32   :  { %s786_s30 = sld [smem:[#allocation2 + $0x2a]]  ;;  %v289_v3 = vstv %s714_s25  ;;  %v851_v23 = vmul.f32 %v281_v61, %v655_v0  ;;  %v857_v33 = vmul.f32 %v281_v61, %v659_v2 }
  0x33   :  { %s798_s1 = sld [smem:[#allocation2 + $0x2b]]  ;;  %v304_v13 = vstv %s730_s26  ;;  %v860_v36 = vmul.f32 %v289_v3, %v655_v0  ;;  %v867_v44 = vmul.f32 %v289_v3, %v659_v2 }
  0x34   :  { %s810_s5 = sld [smem:[#allocation2 + $0x2f]]  ;;  %v324_v41 = vstv %s742_s27  ;;  %v873_v49 = vmul.f32 %v304_v13, %v655_v0  ;;  %v880_v60 = vmul.f32 %v304_v13, %v659_v2 }
  0x35   :  { %s820_s2 = sld [smem:[#allocation7]]  ;;  %v295_v9 = vstv %s752_s28  ;;  %1020 = vst [vmem:[#allocation17_spill] sm:$0xff] %v867_v44  ;;  %v898_v13 = vmul.f32 %v324_v41, %v659_v2 }
  0x36   :  { %s832_s3 = sld [smem:[#allocation7 + $0x1]]  ;;  %v310_v29 = vstv %s764_s0  ;;  %v870_v45 = vmul.f32 %v295_v9, %v664_v4  ;;  %1022 = vst [vmem:[#allocation19_spill] sm:$0xff] %v873_v49  ;;  %v877_v57 = vmul.f32 %v295_v9, %v670_v7  ;;  %v895_v9 = vmul.f32 %v324_v41, %v655_v0 }
  0x37   :  { %s842_s6 = sld [smem:[#allocation7 + $0x2]]  ;;  %v330_v53 = vstv %s774_s29  ;;  %1024 = vst [vmem:[#allocation21_spill] sm:$0xff] %v880_v60  ;;  %v883_v61 = vmul.f32 %v310_v29, %v664_v4  ;;  %v886_v3 = vmul.f32 %v310_v29, %v670_v7 }
  0x38   :  { %s854_s7 = sld [smem:[#allocation7 + $0x3]]  ;;  %v315_v37 = vstv %s786_s30  ;;  %1021 = vst [vmem:[#allocation18_spill] sm:$0xff] %v870_v45 }
  0x39   :  { %s864_s8 = sld [smem:[#allocation7 + $0x4]]  ;;  %1023 = vst [vmem:[#allocation20_spill] sm:$0xff] %v877_v57  ;;  %v892_v49 = vmul.f32 %v315_v37, %v678_v10  ;;  %v908_v57 = vmul.f32 %v330_v53, %v664_v4 }
  0x3a   :  { %1025 = vst [vmem:[#allocation22_spill] sm:$0xff] %v883_v61  ;;  %s888_s9 = sld [smem:[#allocation7 + $0x5]]  ;;  %v905_v61 = vmul.f32 %v315_v37, %v690_v15  ;;  %v340_v60 = vstv %s810_s5 }
  0x3b   :  { %1026 = vst [vmem:[#allocation23_spill] sm:$0xff] %v886_v3  ;;  %v142_v45 = vstv %s820_s2  ;;  %s900_s10 = sld [smem:[#allocation7 + $0x6]] }
  0x3c   :  { %1027 = vst [vmem:[#allocation24_spill] sm:$0xff] %v892_v49  ;;  %v143_v29 = vadd.f32 %v142_v45, %v681_v11  ;;  %v150_v3 = vstv %s832_s3  ;;  %s910_s11 = sld [smem:[#allocation7 + $0x7]]  ;;  %v144_v0 = vadd.f32 %v142_v45, %v693_v16 }
  0x3d   :  { %1028 = vst [vmem:[#allocation25_spill] sm:$0xff] %v895_v9  ;;  %v151_v2 = vadd.f32 %v150_v3, %v673_v8  ;;  %v152_v41 = vadd.f32 %v150_v3, %v684_v12  ;;  %v165_v49 = vstv %s842_s6  ;;  %v335_v9 = vstv %s798_s1  ;;  %s928_s12 = sld [smem:[#allocation7 + $0x8]] }
  0x3e   :  { %1029 = vst [vmem:[#allocation26_spill] sm:$0xff] %v898_v13  ;;  %v166_v13 = vadd.f32 %v165_v49, %v699_v18  ;;  %v167_v11 = vadd.f32 %v165_v49, %v708_v21  ;;  %v145_v45 = vmul.f32 %v143_v29, %v143_v29  ;;  %v146_v18 = vmul.f32 %v144_v0, %v144_v0  ;;  %s955_s13 = sld [smem:[#allocation9]] }
  0x3f   :  { %1030 = vst [vmem:[#allocation27_spill] sm:$0xff] %v905_v61  ;;  %v156_v37 = vadd.f32 %v696_v17, %v151_v2  ;;  %v157_v4 = vadd.f32 %v705_v20, %v152_v41  ;;  %v213_v61 = vstv %s864_s8  ;;  %v939_v49 = vmul.f32 %v335_v9, %v678_v10  ;;  %s957_s14 = sld [smem:[#allocation7 + $0x9]] }
  0x40   :  { %1031 = vst [vmem:[#allocation28_spill] sm:$0xff] %v908_v57  ;;  %v185_v57 = vstv %s854_s7  ;;  %v171_v44 = vadd.f32 %v721_v26, %v166_v13  ;;  %v172_v16 = vadd.f32 %v724_v27, %v167_v11  ;;  %v214_v26 = vadd.f32 %v213_v61, %v767_v42  ;;  %s966_s15 = sld [smem:[#allocation7 + $0xa]] }
  0x41   :  { %v186_v8 = vadd.f32 %v185_v57, %v711_v22  ;;  %v187_v12 = vadd.f32 %v185_v57, %v736_v31  ;;  %v158_v3 = vmul.f32 %v156_v37, %v156_v37  ;;  %v159_v21 = vmul.f32 %v157_v4, %v157_v4  ;;  %s975_s16 = sld [smem:[#allocation7 + $0xb]] }
  0x42   :  { %v176_v17 = vadd.f32 %v727_v28, %v171_v44  ;;  %v215_v27 = vadd.f32 %v213_v61, %v770_v43  ;;  %v177_v22 = vadd.f32 %v733_v30, %v172_v16  ;;  %v936_v31 = vmul.f32 %v330_v53, %v670_v7  ;;  %s982_s17 = sld [smem:[#allocation9 + $0x1]] }
  0x43   :  { %v191_v20 = vadd.f32 %v739_v32, %v186_v8  ;;  %v942_v57 = vmul.f32 %v335_v9, %v690_v15  ;;  %v192_v13 = vadd.f32 %v745_v34, %v187_v12  ;;  %v947_v32 = vmul.f32 %v340_v60, %v716_v24  ;;  %s465_s18 = sld [smem:[#allocation9 + $0x2]] }
  0x44   :  { %v950_v42 = vmul.f32 %v340_v60, %v718_v25  ;;  %v160_v30 = vadd.f32 %v158_v3, %v145_v45  ;;  %v221_v43 = vstv %s888_s9  ;;  %v236_v7 = vstv %s900_s10 }
  0x45   :  { %v196_v28 = vadd.f32 %v748_v35, %v191_v20  ;;  %v256_v44 = vstv %s910_s11  ;;  %v161_v10 = vadd.f32 %v159_v21, %v146_v18  ;;  %v178_v53 = vmul.f32 %v176_v17, %v176_v17 }
  0x46   :  { %v216_v15 = vmul.f32 %v214_v26, %v214_v26  ;;  %v217_v61 = vmul.f32 %v215_v27, %v215_v27  ;;  %v179_v34 = vmul.f32 %v177_v22, %v177_v22  ;;  %v222_v24 = vadd.f32 %v221_v43, %v777_v46  ;;  %v1032_v27 = vld [vmem:[#allocation17_spill] sm:$0xff] }
  0x47   :  { %v223_v35 = vadd.f32 %v221_v43, %v780_v47  ;;  %v237_v25 = vadd.f32 %v236_v7, %v792_v51  ;;  %v197_v60 = vadd.f32 %v755_v38, %v192_v13  ;;  %v201_v9 = vadd.f32 %v758_v39, %v196_v28  ;;  %v1033_v28 = vld [vmem:[#allocation18_spill] sm:$0xff]  ;;  %v1035_v43 = vld [vmem:[#allocation21_spill] sm:$0xff] }
  0x48   :  { %v238_v29 = vadd.f32 %v236_v7, %v795_v52  ;;  %v257_v0 = vadd.f32 %v256_v44, %v816_v59  ;;  %v227_v2 = vadd.f32 %v783_v48, %v222_v24  ;;  %v258_v47 = vadd.f32 %v256_v44, %v823_v62 }
  0x49   :  { %v228_v41 = vadd.f32 %v789_v50, %v223_v35  ;;  %v242_v46 = vadd.f32 %v801_v54, %v237_v25  ;;  %v180_v11 = vadd.f32 %v178_v53, %v160_v30  ;;  %v284_v39 = vstv %s928_s12  ;;  %v1034_v30 = vld [vmem:[#allocation19_spill] sm:$0xff] }
  0x4a   :  { %v243_v51 = vadd.f32 %v804_v55, %v238_v29  ;;  %v262_v38 = vadd.f32 %v826_v63, %v257_v0  ;;  %v229_v52 = vmul.f32 %v227_v2, %v227_v2  ;;  %v263_v48 = vadd.f32 %v829_v1, %v258_v47  ;;  %v1038_v35 = vld [vmem:[#allocation23_spill] sm:$0xff]  ;;  %v1039_v29 = vld [vmem:[#allocation25_spill] sm:$0xff]  ;;  %v1040_v2 = vld [vmem:[#allocation26_spill] sm:$0xff] }
  0x4b   :  { %v230_v59 = vmul.f32 %v228_v41, %v228_v41  ;;  %v247_v37 = vadd.f32 %v807_v56, %v242_v46  ;;  %v202_v50 = vadd.f32 %v761_v40, %v197_v60  ;;  %v203_v54 = vmul.f32 %v201_v9, %v201_v9 }
  0x4c   :  { %v248_v62 = vadd.f32 %v813_v58, %v243_v51  ;;  %v267_v55 = vadd.f32 %v835_v5, %v262_v38  ;;  %v231_v63 = vadd.f32 %v229_v52, %v216_v15  ;;  %v268_v8 = vadd.f32 %v838_v6, %v263_v48  ;;  %v1042_v38 = vld [vmem:[#allocation27_spill] sm:$0xff] }
  0x4d   :  { %v232_v4 = vadd.f32 %v230_v59, %v217_v61  ;;  %v249_v16 = vmul.f32 %v247_v37, %v247_v37  ;;  %v181_v12 = vadd.f32 %v179_v34, %v161_v10  ;;  %v207_v56 = vstv %s955_s13  ;;  %v1036_v10 = vld [vmem:[#allocation20_spill] sm:$0xff]  ;;  %v1037_v34 = vld [vmem:[#allocation22_spill] sm:$0xff] }
  0x4e   :  { %v250_v45 = vmul.f32 %v248_v62, %v248_v62  ;;  %v272_v1 = vadd.f32 %v845_v14, %v267_v55  ;;  %v273_v40 = vadd.f32 %v848_v19, %v268_v8  ;;  %v285_v18 = vadd.f32 %v284_v39, %v851_v23  ;;  %v1043_v37 = vld [vmem:[#allocation28_spill] sm:$0xff] }
  0x4f   :  { %v286_v58 = vadd.f32 %v284_v39, %v857_v33  ;;  %v292_v5 = vstv %s957_s14  ;;  %v204_v3 = vmul.f32 %v202_v50, %v202_v50  ;;  %v205_v21 = vadd.f32 %v203_v54, %v180_v11  ;;  %v1041_v11 = vld [vmem:[#allocation24_spill] sm:$0xff] }
  0x50   :  { %v251_v17 = vadd.f32 %v249_v16, %v231_v63  ;;  %v293_v20 = vadd.f32 %v292_v5, %v860_v36  ;;  %v252_v6 = vadd.f32 %v250_v45, %v232_v4  ;;  %v274_v26 = vmul.f32 %v272_v1, %v272_v1 }
  0x51   :  { %v294_v22 = vadd.f32 %v292_v5, %v1032_v27  ;;  %v307_v13 = vstv %s966_s15  ;;  %v275_v14 = vmul.f32 %v273_v40, %v273_v40  ;;  %v287_v7 = vmul.f32 %v285_v18, %v285_v18 }
  0x52   :  { %v298_v19 = vadd.f32 %v1033_v28, %v293_v20  ;;  %v308_v23 = vadd.f32 %v307_v13, %v1034_v30  ;;  %v309_v33 = vadd.f32 %v307_v13, %v1035_v43  ;;  %v288_v44 = vmul.f32 %v286_v58, %v286_v58 }
  0x53   :  { %v299_v53 = vadd.f32 %v1036_v10, %v294_v22  ;;  %v327_v15 = vstv %s975_s16  ;;  %v206_v61 = vadd.f32 %v204_v3, %v181_v12  ;;  %v278_v60 = vstv %s982_s17 }
  0x54   :  { %v300_v36 = vmul.f32 %v298_v19, %v298_v19  ;;  %v313_v24 = vadd.f32 %v1037_v34, %v308_v23  ;;  %v314_v25 = vadd.f32 %v1038_v35, %v309_v33  ;;  %v328_v0 = vadd.f32 %v327_v15, %v1039_v29 }
  0x55   :  { %v301_v9 = vmul.f32 %v299_v53, %v299_v53  ;;  %v329_v41 = vadd.f32 %v327_v15, %v1040_v2  ;;  %v276_v46 = vadd.f32 %v274_v26, %v251_v17  ;;  %v277_v47 = vadd.f32 %v275_v14, %v252_v6 }
  0x56   :  { %v318_v51 = vadd.f32 %v1041_v11, %v313_v24  ;;  %v319_v39 = vadd.f32 %v1042_v38, %v314_v25  ;;  %v302_v52 = vadd.f32 %v300_v36, %v287_v7  ;;  %v333_v48 = vadd.f32 %v1043_v37, %v328_v0 }
  0x57   :  { %v303_v59 = vadd.f32 %v301_v9, %v288_v44  ;;  %v334_v50 = vadd.f32 %v936_v31, %v329_v41  ;;  %v208_v4 = vsub.f32 %v207_v56, %v205_v21  ;;  %v209_v16 = vsub.f32 %v207_v56, %v206_v61 }
  0x58   :  { %v320_v54 = vmul.f32 %v318_v51, %v318_v51  ;;  %v321_v62 = vmul.f32 %v319_v39, %v319_v39  ;;  %v338_v55 = vadd.f32 %v939_v49, %v333_v48  ;;  %v279_v8 = vsub.f32 %v278_v60, %v276_v46 }
  0x59   :  { %v339_v63 = vadd.f32 %v942_v57, %v334_v50  ;;  %v280_v12 = vsub.f32 %v278_v60, %v277_v47  ;;  %v349_v3 = vstv %s465_s18  ;;  %v116_v33 = vlaneseq }
  0x5a   :  { %v322_v45 = vadd.f32 %v320_v54, %v302_v52  ;;  %v323_v1 = vadd.f32 %v321_v62, %v303_v59  ;;  %v343_v40 = vadd.f32 %v947_v32, %v338_v55  ;;  %v352_v20 = vmax.f32 %v208_v4, %v279_v8 }
  0x5b   :  { %v344_v18 = vadd.f32 %v950_v42, %v339_v63  ;;  %v353_v6 = vmax.f32 %v209_v16, %v280_v12  ;;  %v117_v44 = vshrl.u32 %v116_v33, 7  ;;  %v122_v29 = vand.u32 127, %v116_v33 }
  0x5c   :  { %v345_v58 = vmul.f32 %v343_v40, %v343_v40 }
  0x5d   :  { %v346_v5 = vmul.f32 %v344_v18, %v344_v18  ;;  %v118_v34 = vadd.s32 8, %v117_v44  ;;  %v119_v9 = vmul.u32 128, %v117_v44 }
  0x5e   :  { %v347_v31 = vadd.f32 %v345_v58, %v322_v45 }
  0x5f   :  { %v348_v17 = vadd.f32 %v346_v5, %v323_v1  ;;  %v120_v0 = vmul.u32 128, %v118_v34  ;;  %v123_v2 = vadd.s32 %v122_v29, %v119_v9 }
  0x60   :  { %v350_v49 = vsub.f32 %v349_v3, %v347_v31 }
  0x61   :  { %v351_v26 = vsub.f32 %v349_v3, %v348_v17  ;;  %v124_v41 = vadd.s32 %v122_v29, %v120_v0  ;;  %vm387_vm0 = vcmp.lt.s32.totalorder %v123_v2, 200 }
  0x62   :  { %v354_v57 = vmax.f32 %v352_v20, %v350_v49 }
  0x63   :  { %v355_v21 = vmax.f32 %v353_v6, %v351_v26  ;;  %vm388_vm1 = vcmp.lt.s32.totalorder %v124_v41, 200 }
  0x64   :  { %v356_v56 = vsub.f32 %v208_v4, %v354_v57  ;;  %v362_v22 = vsub.f32 %v279_v8, %v354_v57  ;;  %v370_v14 = vsub.f32 %v350_v49, %v354_v57 }
  0x65   :  { %v357_v27 = vsub.f32 %v209_v16, %v355_v21  ;;  %v363_v13 = vsub.f32 %v280_v12, %v355_v21  ;;  %v371_v28 = vsub.f32 %v351_v26, %v355_v21 }
  0x66   :  { %v358_v32 = vmul.f32 1.442695, %v356_v56  ;;  %v364_v42 = vmul.f32 1.442695, %v362_v22  ;;  %v372_v23 = vmul.f32 1.442695, %v370_v14 }
  0x67   :  { %v360_v19 = vmul.f32 1.442695, %v357_v27  ;;  %v366_v30 = vmul.f32 1.442695, %v363_v13  ;;  %v374_v43 = vmul.f32 1.442695, %v371_v28 }
  0x68   :  { %473 = vpow2.f32 %v358_v32 }
  0x69   :  { %475 = vpow2.f32 %v360_v19 }
  0x6a   :  { %477 = vpow2.f32 %v364_v42 }
  0x6b   :  { %479 = vpow2.f32 %v366_v30 }
  0x6c   :  { %481 = vpow2.f32 %v372_v23 }
  0x6d   :  { %483 = vpow2.f32 %v374_v43 }
  0x6e   :  { %v474_v7 = vpop.eup %473 }
  0x6f   :  { %v476_v10 = vpop.eup %475 }
  0x70   :  { %v478_v53 = vpop.eup %477 }
  0x71   :  { %v480_v15 = vpop.eup %479  ;;  %v368_v61 = vadd.f32 %v478_v53, %v474_v7 }
  0x72   :  { %v482_v36 = vpop.eup %481  ;;  %v369_v24 = vadd.f32 %v480_v15, %v476_v10 }
  0x73   :  { %v484_v35 = vpop.eup %483  ;;  %v376_v25 = vadd.f32 %v482_v36, %v368_v61 }
  0x74   :  { %v377_v60 = vadd.f32 %v484_v35, %v369_v24 }
  0x75   :  { %485 = vlog2.f32 %v376_v25 }
  0x76   :  { %487 = vlog2.f32 %v377_v60 }
  0x7b   :  { %v486_v46 = vpop.eup %485 }
  0x7c   :  { %v488_v47 = vpop.eup %487  ;;  %v379_v11 = vmul.f32 0.6931472, %v486_v46 }
  0x7d   :  { %v381_v51 = vmul.f32 0.6931472, %v488_v47 }
  0x7e   :  { %v382_v38 = vadd.f32 %v379_v11, %v354_v57 }
  0x7f   :  { %v383_v39 = vadd.f32 %v381_v51, %v355_v21 }
  0x80   :  { %v389_v52 = vsel %vm387_vm0, %v382_v38, 0.0 }
  0x81   :  { %v390_v59 = vsel %vm388_vm1, %v383_v39, 0.0 }
  0x82   :  { %v393_v37 = vadd.f32 %v390_v59, %v389_v52 }
  0x84   :  { %v394_v48 = vrot.slane %v393_v37, 4 }
  0x86   :  { %v395_v50 = vadd.f32 %v394_v48, %v393_v37 }
  0x88   :  { %v396_v54 = vrot.slane %v395_v50, 2 }
  0x8a   :  { %v397_v62 = vadd.f32 %v396_v54, %v395_v50 }
  0x8c   :  { %v398_v55 = vrot.slane %v397_v62, 1 }
  0x8e   :  { %v399_v63 = vadd.f32 %v398_v55, %v397_v62 }
  0x90   :  { %400 = vst [vmem:[#allocation11] sm:$0x1] %v399_v63 }
  0x91   :  { %411 = dma.vmem_to_hbm [thread:$0]  %s407_s20, 16, %s409_s23, [#allocation4]  }
  0x92   :  { %581 = dma.done.wait [#allocation4], 16  }
  0x93   :  { %582 = vsyncadd [#allocation4], 4294967280 }
  0x94   :  { %416 = vsyncpa [#allocation3], 1 }
  0x95   :  { %417 = vsyncpa [#allocation4], 1 }
  0x96   :  { %418 = vsyncpa [#allocation5], 1 }
  0x97   :  { %419 = vsyncpa [#allocation8], 1 }
  0x98   :  { %420 = vsyncpa [#allocation6], 1 }

</bundles_post_ra>
